<compile_context>
chip_gen: v5e
topology: v5e:2x2
jax: 0.10.0
libtpu: 0.0.40
codegen_flags: <defaults>
</compile_context>

<pallas_src>
import jax
import jax.numpy as jnp
from jax.experimental import pallas as pl
from jax.experimental.pallas import tpu as pltpu


# ---------------------------------------------------------------------------
# Fused CBAM kernel (one batch element per grid step)
# ---------------------------------------------------------------------------
def cbam_fused_kernel(x_ref, w1_ref, w2_ref, ka_ref, km_ref, b_ref, o_ref):
    """x_ref/o_ref: (C, HW); w1_ref: (Cr, C); w2_ref: (C, Cr);
    ka_ref/km_ref: (HW, HW) dense 7x7-conv matrices; b_ref: (1,) SMEM scalar."""
    x = x_ref[...]                                      # (C, HW) f32

    # ---- channel attention: global avg/max pool + shared MLP --------------
    avg = jnp.mean(x, axis=1, keepdims=True)            # (C, 1)  lane reduce
    mx = jnp.max(x, axis=1, keepdims=True)              # (C, 1)
    w1 = w1_ref[...]                                    # (Cr, C)
    w2 = w2_ref[...]                                    # (C, Cr)
    # Second MLP layer is linear, so MLP(avg)+MLP(max) = W2 @ (relu(W1@avg)+relu(W1@max))
    h = (jnp.maximum(jnp.dot(w1, avg, preferred_element_type=jnp.float32), 0.0)
         + jnp.maximum(jnp.dot(w1, mx, preferred_element_type=jnp.float32), 0.0))
    ch = jax.nn.sigmoid(jnp.dot(w2, h, preferred_element_type=jnp.float32))  # (C, 1)
    xc = x * ch                                         # broadcast over lanes

    # ---- spatial attention: mean/max over channels + 7x7 conv (as MXU dots)
    amap = jnp.mean(xc, axis=0, keepdims=True)          # (1, HW) sublane reduce
    mmap = jnp.max(xc, axis=0, keepdims=True)           # (1, HW)
    logits = (jnp.dot(amap, ka_ref[...], preferred_element_type=jnp.float32)
              + jnp.dot(mmap, km_ref[...], preferred_element_type=jnp.float32)
              + b_ref[0])                               # (1, HW)
    sp = jax.nn.sigmoid(logits)

    o_ref[...] = xc * sp                                # broadcast over sublanes


# ---------------------------------------------------------------------------
# Wrapper
# ---------------------------------------------------------------------------
def _build_conv_matrices(w_sp, H, W):
    """Dense (HW, HW) matrices KA, KM so that for flattened (row-major) maps
    conv_logits_flat = amap_flat @ KA + mmap_flat @ KM  (7x7 conv, zero pad 3)."""
    HW = H * W
    wa = w_sp[0, 0]                                     # (7, 7) taps on avg map
    wm = w_sp[0, 1]                                     # (7, 7) taps on max map
    idx = jnp.arange(HW)
    h_i = idx // W
    w_i = idx % W
    dh = h_i[:, None] - h_i[None, :]                    # dh[q, p] = h(q) - h(p)
    dw = w_i[:, None] - w_i[None, :]
    valid = (jnp.abs(dh) <= 3) & (jnp.abs(dw) <= 3)
    di = jnp.clip(dh + 3, 0, 6)
    dj = jnp.clip(dw + 3, 0, 6)
    ka = jnp.where(valid, wa[di, dj], 0.0).astype(jnp.float32)
    km = jnp.where(valid, wm[di, dj], 0.0).astype(jnp.float32)
    return ka, km


def cbam_forward(x, w1, w2, w_sp, b_sp):
    """x: (B, C, H, W) f32 (NCHW).
    w1: (Cr, C)  -- Conv2d(C, C//r, 1, bias=False).weight squeezed
    w2: (C, Cr)  -- Conv2d(C//r, C, 1, bias=False).weight squeezed
    w_sp: (1, 2, 7, 7) -- Conv2d(2, 1, 7, padding=3).weight
    b_sp: (1,)          -- its bias
    """
    B, C, H, W = x.shape
    Cr = w1.shape[0]
    HW = H * W

    x_flat = x.reshape(B, C, HW)           # free reshape: NCHW is (B, C, H*W)-contiguous
    ka, km = _build_conv_matrices(w_sp, H, W)

    out_flat = pl.pallas_call(
        cbam_fused_kernel,
        out_shape=jax.ShapeDtypeStruct((B, C, HW), jnp.float32),
        grid=(B,),
        in_specs=[
            pl.BlockSpec((None, C, HW), lambda b: (b, 0, 0)),
            pl.BlockSpec((Cr, C), lambda b: (0, 0)),
            pl.BlockSpec((C, Cr), lambda b: (0, 0)),
            pl.BlockSpec((HW, HW), lambda b: (0, 0)),
            pl.BlockSpec((HW, HW), lambda b: (0, 0)),
            pl.BlockSpec(memory_space=pltpu.MemorySpace.SMEM),
        ],
        out_specs=pl.BlockSpec((None, C, HW), lambda b: (b, 0, 0)),
        compiler_params=pltpu.CompilerParams(
            dimension_semantics=("parallel",)),
    )(x_flat, w1, w2, ka, km, b_sp)

    return out_flat.reshape(B, C, H, W)


# ---------------------------------------------------------------------------
# Pure-JAX reference (mirrors the PyTorch forward) for a correctness check.
# ---------------------------------------------------------------------------
def cbam_reference(x, w1, w2, w_sp, b_sp):
    avg = x.mean(axis=(2, 3))                 # (B, C)
    mx = x.max(axis=(2, 3))                   # (B, C)

    def mlp(v):
        return jnp.maximum(v @ w1.T, 0.0) @ w2.T

    ch = jax.nn.sigmoid(mlp(avg) + mlp(mx))   # (B, C)
    xc = x * ch[:, :, None, None]

    sa = xc.mean(axis=1, keepdims=True)       # (B,1,H,W)
    sm = xc.max(axis=1, keepdims=True)        # (B,1,H,W)
    stacked = jnp.concatenate([sa, sm], axis=1)
    conv = jax.lax.conv_general_dilated(
        stacked, w_sp, window_strides=(1, 1),
        padding=[(3, 3), (3, 3)],
        dimension_numbers=("NCHW", "OIHW", "NCHW")) + b_sp.reshape(1, 1, 1, 1)
    sp = jax.nn.sigmoid(conv)
    return xc * sp


if __name__ == "__main__":
    B, C, H, W = 2, 32, 16, 16
    reduction = 16
    Cr = C // reduction

    key = jax.random.PRNGKey(0)
    k1, k2, k3, k4, kx = jax.random.split(key, 5)
    # deterministic synthetic parameters (shapes from CBAM.__init__)
    w1 = jax.random.normal(k1, (Cr, C), jnp.float32) * 0.2        # Conv2d(C, C//r, 1)
    w2 = jax.random.normal(k2, (C, Cr), jnp.float32) * 0.2        # Conv2d(C//r, C, 1)
    w_sp = jax.random.normal(k3, (1, 2, 7, 7), jnp.float32) * 0.1  # Conv2d(2, 1, 7, pad=3)
    b_sp = jax.random.normal(k4, (1,), jnp.float32) * 0.1

    x = jax.random.normal(kx, (B, C, H, W), jnp.float32)

    out = cbam_forward(x, w1, w2, w_sp, b_sp)
    out = jax.block_until_ready(out)

    ref = cbam_reference(x, w1, w2, w_sp, b_sp)
    assert out.shape == (B, C, H, W)
    assert jnp.allclose(out, ref, atol=1e-4, rtol=1e-4), float(
        jnp.max(jnp.abs(out - ref)))

    print("KERNEL_OK")
</pallas_src>

<mosaic_0001>
module attributes {stable_mosaic.version = 11 : i64} {
  func.func @cbam_fused_kernel(%arg0: i32, %arg1: memref<1x32x256xf32, #tpu.memory_space<vmem>>, %arg2: memref<2x32xf32, #tpu.memory_space<vmem>>, %arg3: memref<32x2xf32, #tpu.memory_space<vmem>>, %arg4: memref<256x256xf32, #tpu.memory_space<vmem>>, %arg5: memref<256x256xf32, #tpu.memory_space<vmem>>, %arg6: memref<1xf32, #tpu.memory_space<smem>>, %arg7: memref<1x32x256xf32, #tpu.memory_space<vmem>>) attributes {dimension_semantics = [#tpu.dimension_semantics<parallel>], iteration_bounds = array<i64: 2>, scalar_prefetch = 0 : i64, scratch_operands = 0 : i64, tpu.core_type = #tpu.core_type<tc>, window_params = [{transform_indices = @transform_0, window_bounds = array<i64: 1, 32, 256>}, {pipeline_mode = #tpu.pipeline_mode<synchronous>, transform_indices = @transform_1, window_bounds = array<i64: 2, 32>}, {pipeline_mode = #tpu.pipeline_mode<synchronous>, transform_indices = @transform_2, window_bounds = array<i64: 32, 2>}, {pipeline_mode = #tpu.pipeline_mode<synchronous>, transform_indices = @transform_3, window_bounds = array<i64: 256, 256>}, {pipeline_mode = #tpu.pipeline_mode<synchronous>, transform_indices = @transform_4, window_bounds = array<i64: 256, 256>}, {transform_indices = @transform_5, window_bounds = array<i64: 1>}, {transform_indices = @transform_6, window_bounds = array<i64: 1, 32, 256>}]} {
    %c0 = arith.constant 0 : index
    %c0_0 = arith.constant 0 : index
    %c0_1 = arith.constant 0 : index
    %0 = vector.load %arg1[%c0, %c0_0, %c0_1] : memref<1x32x256xf32, #tpu.memory_space<vmem>>, vector<1x32x256xf32>
    %1 = vector.shape_cast %0 : vector<1x32x256xf32> to vector<32x256xf32>
    %cst = arith.constant dense<0.000000e+00> : vector<32xf32>
    %2 = vector.multi_reduction <add>, %1, %cst [1] : vector<32x256xf32> to vector<32xf32>
    %3 = vector.shape_cast %2 : vector<32xf32> to vector<32x1xf32>
    %cst_2 = arith.constant 2.560000e+02 : f32
    %4 = vector.broadcast %cst_2 : f32 to vector<32x1xf32>
    %5 = arith.divf %3, %4 : vector<32x1xf32>
    %cst_3 = arith.constant dense<0xFF800000> : vector<32xf32>
    %6 = vector.multi_reduction <maximumf>, %1, %cst_3 [1] : vector<32x256xf32> to vector<32xf32>
    %7 = vector.shape_cast %6 : vector<32xf32> to vector<32x1xf32>
    %c0_4 = arith.constant 0 : index
    %c0_5 = arith.constant 0 : index
    %8 = vector.load %arg2[%c0_4, %c0_5] : memref<2x32xf32, #tpu.memory_space<vmem>>, vector<2x32xf32>
    %c0_6 = arith.constant 0 : index
    %c0_7 = arith.constant 0 : index
    %9 = vector.load %arg3[%c0_6, %c0_7] : memref<32x2xf32, #tpu.memory_space<vmem>>, vector<32x2xf32>
    %cst_8 = arith.constant dense<0.000000e+00> : vector<2x1xf32>
    %10 = tpu.matmul %8, %5, %cst_8 {dimension_numbers = #tpu.dot_dimension_numbers<[1], [0], [0], [1], [0, 0, 1, 1], [], []>} : vector<2x32xf32>, vector<32x1xf32>, vector<2x1xf32> -> vector<2x1xf32>
    %cst_9 = arith.constant 0.000000e+00 : f32
    %11 = vector.broadcast %cst_9 : f32 to vector<2x1xf32>
    %12 = arith.maximumf %10, %11 : vector<2x1xf32>
    %cst_10 = arith.constant dense<0.000000e+00> : vector<2x1xf32>
    %13 = tpu.matmul %8, %7, %cst_10 {dimension_numbers = #tpu.dot_dimension_numbers<[1], [0], [0], [1], [0, 0, 1, 1], [], []>} : vector<2x32xf32>, vector<32x1xf32>, vector<2x1xf32> -> vector<2x1xf32>
    %cst_11 = arith.constant 0.000000e+00 : f32
    %14 = vector.broadcast %cst_11 : f32 to vector<2x1xf32>
    %15 = arith.maximumf %13, %14 : vector<2x1xf32>
    %16 = arith.addf %12, %15 : vector<2x1xf32>
    %cst_12 = arith.constant dense<0.000000e+00> : vector<32x1xf32>
    %17 = tpu.matmul %9, %16, %cst_12 {dimension_numbers = #tpu.dot_dimension_numbers<[1], [0], [0], [1], [0, 0, 1, 1], [], []>} : vector<32x2xf32>, vector<2x1xf32>, vector<32x1xf32> -> vector<32x1xf32>
    %18 = arith.negf %17 : vector<32x1xf32>
    %19 = math.exp %18 : vector<32x1xf32>
    %cst_13 = arith.constant 1.000000e+00 : f32
    %20 = vector.broadcast %cst_13 : f32 to vector<32x1xf32>
    %21 = arith.addf %20, %19 : vector<32x1xf32>
    %22 = arith.divf %20, %21 : vector<32x1xf32>
    %23 = vector.broadcast %22 : vector<32x1xf32> to vector<32x256xf32>
    %24 = arith.mulf %1, %23 : vector<32x256xf32>
    %cst_14 = arith.constant dense<0.000000e+00> : vector<256xf32>
    %25 = vector.multi_reduction <add>, %24, %cst_14 [0] : vector<32x256xf32> to vector<256xf32>
    %26 = vector.shape_cast %25 : vector<256xf32> to vector<1x256xf32>
    %cst_15 = arith.constant 3.200000e+01 : f32
    %27 = vector.broadcast %cst_15 : f32 to vector<1x256xf32>
    %28 = arith.divf %26, %27 : vector<1x256xf32>
    %cst_16 = arith.constant dense<0xFF800000> : vector<256xf32>
    %29 = vector.multi_reduction <maximumf>, %24, %cst_16 [0] : vector<32x256xf32> to vector<256xf32>
    %30 = vector.shape_cast %29 : vector<256xf32> to vector<1x256xf32>
    %c0_17 = arith.constant 0 : index
    %c0_18 = arith.constant 0 : index
    %31 = vector.load %arg4[%c0_17, %c0_18] : memref<256x256xf32, #tpu.memory_space<vmem>>, vector<256x256xf32>
    %cst_19 = arith.constant dense<0.000000e+00> : vector<1x256xf32>
    %32 = tpu.matmul %28, %31, %cst_19 {dimension_numbers = #tpu.dot_dimension_numbers<[1], [0], [0], [1], [0, 0, 1, 1], [], []>} : vector<1x256xf32>, vector<256x256xf32>, vector<1x256xf32> -> vector<1x256xf32>
    %c0_20 = arith.constant 0 : index
    %c0_21 = arith.constant 0 : index
    %33 = vector.load %arg5[%c0_20, %c0_21] : memref<256x256xf32, #tpu.memory_space<vmem>>, vector<256x256xf32>
    %cst_22 = arith.constant dense<0.000000e+00> : vector<1x256xf32>
    %34 = tpu.matmul %30, %33, %cst_22 {dimension_numbers = #tpu.dot_dimension_numbers<[1], [0], [0], [1], [0, 0, 1, 1], [], []>} : vector<1x256xf32>, vector<256x256xf32>, vector<1x256xf32> -> vector<1x256xf32>
    %35 = arith.addf %32, %34 : vector<1x256xf32>
    %c0_23 = arith.constant 0 : index
    %36 = memref.load %arg6[%c0_23] : memref<1xf32, #tpu.memory_space<smem>>
    %37 = vector.broadcast %36 : f32 to vector<1x256xf32>
    %38 = arith.addf %35, %37 : vector<1x256xf32>
    %39 = arith.negf %38 : vector<1x256xf32>
    %40 = math.exp %39 : vector<1x256xf32>
    %cst_24 = arith.constant 1.000000e+00 : f32
    %41 = vector.broadcast %cst_24 : f32 to vector<1x256xf32>
    %42 = arith.addf %41, %40 : vector<1x256xf32>
    %43 = arith.divf %41, %42 : vector<1x256xf32>
    %44 = vector.broadcast %43 : vector<1x256xf32> to vector<32x256xf32>
    %45 = arith.mulf %24, %44 : vector<32x256xf32>
    %c0_25 = arith.constant 0 : index
    %c0_26 = arith.constant 0 : index
    %c0_27 = arith.constant 0 : index
    %46 = vector.load %arg7[%c0_25, %c0_26, %c0_27] : memref<1x32x256xf32, #tpu.memory_space<vmem>>, vector<1x32x256xf32>
    %47 = vector.shape_cast %46 : vector<1x32x256xf32> to vector<32x256xf32>
    %48 = vector.shape_cast %45 : vector<32x256xf32> to vector<1x32x256xf32>
    tpu.vector_store %arg7[%c0_25, %c0_26, %c0_27], %48 {strides = array<i32>} : memref<1x32x256xf32, #tpu.memory_space<vmem>>, vector<1x32x256xf32>,
    return
  }
  func.func @transform_0(%arg0: i32) -> (i32, i32, i32) {
    %c0_i32 = arith.constant 0 : i32
    %c0_i32_0 = arith.constant 0 : i32
    %c0_i32_1 = arith.constant 0 : i32
    return %arg0, %c0_i32, %c0_i32_0 : i32, i32, i32
  }
  func.func @transform_1(%arg0: i32) -> (i32, i32) {
    %c0_i32 = arith.constant 0 : i32
    %c0_i32_0 = arith.constant 0 : i32
    %c0_i32_1 = arith.constant 0 : i32
    return %c0_i32, %c0_i32_0 : i32, i32
  }
  func.func @transform_2(%arg0: i32) -> (i32, i32) {
    %c0_i32 = arith.constant 0 : i32
    %c0_i32_0 = arith.constant 0 : i32
    %c0_i32_1 = arith.constant 0 : i32
    return %c0_i32, %c0_i32_0 : i32, i32
  }
  func.func @transform_3(%arg0: i32) -> (i32, i32) {
    %c0_i32 = arith.constant 0 : i32
    %c0_i32_0 = arith.constant 0 : i32
    %c0_i32_1 = arith.constant 0 : i32
    return %c0_i32, %c0_i32_0 : i32, i32
  }
  func.func @transform_4(%arg0: i32) -> (i32, i32) {
    %c0_i32 = arith.constant 0 : i32
    %c0_i32_0 = arith.constant 0 : i32
    %c0_i32_1 = arith.constant 0 : i32
    return %c0_i32, %c0_i32_0 : i32, i32
  }
  func.func @transform_5(%arg0: i32) -> i32 {
    %c0_i32 = arith.constant 0 : i32
    %c0_i32_0 = arith.constant 0 : i32
    return %c0_i32 : i32
  }
  func.func @transform_6(%arg0: i32) -> (i32, i32, i32) {
    %c0_i32 = arith.constant 0 : i32
    %c0_i32_0 = arith.constant 0 : i32
    %c0_i32_1 = arith.constant 0 : i32
    return %arg0, %c0_i32, %c0_i32_0 : i32, i32, i32
  }
}

</mosaic_0001>

<bundles_post_ra>
// kernel: tpu_custom_call.1
= control target key start
LH: loop header
LB: loop body
LE: loop exit
PB: predicated region body
PF: predicated region fallthrough
CT: control target
= control target key end

     0   :  { %s1648_s0 = inlined_call_operand.hbm [shape: f32[2,32,256], index: 0, kind: input, shape index: {}]   ;;  %s1649_s1 = inlined_call_operand.vmem [shape: f32[2,32], index: 1, kind: input, shape index: {}]   ;;  %s1650_s2 = inlined_call_operand.vmem [shape: f32[32,2], index: 2, kind: input, shape index: {}]   ;;  %s1651_s3 = inlined_call_operand.hbm [shape: f32[256,256], index: 3, kind: input, shape index: {}]   ;;  %s1652_s4 = inlined_call_operand.hbm [shape: f32[256,256], index: 4, kind: input, shape index: {}]   ;;  %s1653_s5 = inlined_call_operand.<no memory space> [shape: f32[1], index: 5, kind: input, shape index: {}]   ;;  %s1654_s6 = inlined_call_operand.hbm [shape: f32[2,32,256], index: 6, kind: output, shape index: {}]  }
   0x1   :  { %11 = sst [smem:[#allocation2]] %s1653_s5 }
   0x2   :  { %12 = vsyncpa [#allocation4], 0 }
   0x3   :  { %14 = vsyncpa [#allocation4 + $0x1], 0 }
   0x4   :  { %15 = vsyncpa [#allocation7], 0 }
   0x5   :  { %16 = vsyncpa [#allocation5], 0 }
   0x6   :  { %18 = vsyncpa [#allocation5 + $0x1], 0  ;;  %s1399_s23 = smov 0   ;;  %s1401_s24 = smov 0  }
   0x7   :  { %s1403_s25 = smov 0   ;;  %s1405_s26 = smov 0  }
   0x8 LB: > { %s1420_s5 = sadd.s32 4294967295, %s1350_s26   ;;  %s1052_s27 = sadd.s32 4294967294, %s1350_s26   ;;  %s1350_s26 = sphi %s1405_s26, %s1666_s26   ;;  %s1346_s25 = sphi %s1403_s25, %s1665_s25   ;;  %s1342_s24 = sphi %s1401_s24, %s1664_s24   ;;  %s1338_s23 = sphi %s1399_s23, %s1663_s23  }
   0x9   : > { %p44_p0 = scmp.ne.s32.totalorder %s1342_s24, %s1338_s23  ;;  %p45_p1 = scmp.eq.s32.totalorder %s1420_s5, 0 }
   0xa   : > { %p173_p2 = scmp.eq.s32.totalorder %s1420_s5, 1  ;;  %p179_p3 = scmp.eq.s32.totalorder %s1052_s27, 1 }
   0xb   : > { %p1429_p4 = por %p45_p1, %p44_p0  ;;  %p1053_p5 = scmp.ge.s32.totalorder %s1350_s26, 1 }
   0xc   : > { %p1434_p6 = por %p179_p3, %p44_p0  ;;  %p186_p7 = scmp.lt.s32.totalorder %s1350_s26, 3 }
   0xd   : > { %s203_s8 = sshll.u32 %s1651_s3, 4  ;;  %s1352_s10 = smov [#allocation6]   ;;  %s204_s8 = int_to_ptr.hbm [resolvable:$true] %s203_s8 }
   0xe   : > { %p1442_p8 = pnand %p1053_p5, %p186_p7  ;;  %s205_s11 = sshll.u32 %s1352_s10, 4  ;;  %s206_s11 = int_to_ptr.vmem [resolvable:$true] %s205_s11 }
   0xf   : > { %s217_s14 = sshll.u32 %s1652_s4, 4  ;;  %s1655_s15 = smov 256   ;;  %s218_s14 = int_to_ptr.hbm [resolvable:$true] %s217_s14 }
  0x10   : > { %p1097_p9 = pneg %p1442_p8  ;;  %s1354_s16 = smov 16  }
  0x11   : > { %s1355_s17 = smov [#allocation8]   ;;  %s1461_s19 = sadd.s32 1, %s1350_s26  }
  0x12   : > { %p1098_p10 = pnand %p1097_p9, %p45_p1  ;;  %s219_s18 = sshll.u32 %s1355_s17, 4  ;;  %s220_s18 = int_to_ptr.vmem [resolvable:$true] %s219_s18 }
  0x13   : > { %s31_s20 = sadd.s32 1, %s1346_s25  ;;  %s28_s21 = ssub.s32 %s1350_s26, %s1461_s19 }
  0x14   : > { %1100 = dma.hbm_to_vmem [thread:$0]  (!%p1098_p10), %s204_s8, 8192, %s206_s11, [#allocation7], %s1655_s15, %s1655_s15, %s1354_s16  }
  0x15   : > { %1103 = dma.hbm_to_vmem [thread:$0]  (!%p1098_p10), %s218_s14, 8192, %s220_s18, [#allocation7], %s1655_s15, %s1655_s15, %s1354_s16  }
  0x16   : > { %p38_p12 = scmp.ne.s32.totalorder %s1346_s25, %s1342_s24  ;;  %p29_p13 = scmp.eq.s32.totalorder %s28_s21, 0 }
  0x17   : > { %p39_p0 = scmp.eq.s32.totalorder %s1350_s26, 0  ;;  %p1114_p5 = scmp.lt.s32.totalorder %s1350_s26, 2 }
  0x18   : > { %p1471_p3 = por %p173_p2, %p38_p12  ;;  %s236_s30 = sand.u32 1, %s1346_s25  }
  0x19   : > { %s1477_s27 = scalar_select %p29_p13, %s1346_s25, %s31_s20  }
  0x1a   : > { %p40_p7 = por %p39_p0, %p38_p12  ;;  %s1057_s7 = sshll.u32 %s236_s30, 6 }
  0x1b   : > { %s1083_s8 = sshll.u32 %s1350_s26, 6  ;;  %s240_s13 = scalar_lea.vmem [#allocation3], %s1057_s7 }
  0x1c   : > { %s245_s12 = scalar_lea.hbm %s1648_s0, %s1083_s8  ;;  %s248_s14 = sshll.u32 %s240_s13, 4  ;;  %s249_s14 = int_to_ptr.vmem [resolvable:$true] %s248_s14 }
  0x1d   : > { %s246_s17 = sshll.u32 %s245_s12, 4  ;;  %p1484_p2 = pnand %p1114_p5, %p40_p7  ;;  %s247_s17 = int_to_ptr.hbm [resolvable:$true] %s246_s17 }
  0x1e   : > { %s237_s20 = scalar_lea.sflag [#allocation4], %s236_s30  ;;  %s1250_s21 = sshra.s32 %s247_s17, 4  ;;  %s1251_s21 = int_to_ptr.hbm [resolvable:$true] %s1250_s21 }
  0x1f   : > { %s1252_s15 = scalar_lea.hbm %s1251_s21, 64  ;;  %p1254_p10 = pneg %p1484_p2 }
  0x20   : > { %p1253_p9 = scmp.ne.s32.totalorder %s1251_s21, %s1252_s15  ;;  %s1257_s10 = scalar_lea.hbm %s1648_s0, 128 }
  0x21   : > { %p1258_p0 = scmp.lt.s32.totalorder %s1251_s21, %s1648_s0  ;;  %p1259_p5 = scmp.lt.s32.totalorder %s1257_s10, %s1252_s15 }
  0x22   : > { %p1255_p12 = pnand %p1254_p10, %p1253_p9 }
  0x23   : > { %p1260_p7 = por %p1259_p5, %p1258_p0 }
  0x24   : > { %p1256_p13 = pneg %p1255_p12 }
  0x26   : > { %p1261_p11 = pnand %p1260_p7, %p1256_p13 }
  0x28   : > { %1264 = shalt.err (!%p1261_p11)
}
  0x29   : > { %s1661_s30 = smov 256   ;;  %260 = sbr.rel (%p1442_p8) target bundleno = 812 (0x32c), region = 44 }
  0x2a   : > { %1107 = dma.hbm_to_vmem [thread:$0]  (!%p1484_p2), %s247_s17, 1024, %s249_s14, %s237_s20, %s1661_s30, %s1661_s30, %s1354_s16  }
  0x2b   : > { %s1504_s13 = sand.u32 (!%p1442_p8), 1, %s1342_s24  }
  0x2c   : > { %s1061_s15 = sshll.u32 (!%p1442_p8), %s1504_s13, 6  ;;  %s263_s21 = scalar_lea.sflag (!%p1442_p8), [#allocation4], %s1504_s13 }
  0x2d   : > { %s266_s8 = scalar_lea.vmem (!%p1442_p8), [#allocation3], %s1061_s15 }
  0x2e   : > { %1325 = dma.done.wait (%p1429_p4), %s263_s21, 1024  }
  0x2f   : > { %1327 = vsyncadd (%p1429_p4), %s263_s21, 4294966272 }
  0x30   : > { %1329 = dma.done.wait (%p45_p1), [#allocation7], 16384  }
  0x31   : > { %1331 = vsyncadd (%p45_p1), [#allocation7], 4294950912  ;;  %v1518_v0 = vld [vmem:[%s266_s8 + $0x30] sm:$0xff]  ;;  %v1520_v1 = vld [vmem:[%s266_s8 + $0x38] sm:$0xff]  ;;  %v1356_v16 = vmov 256.0   ;;  %vm354_vm1 = vcmask 261120  }
  0x32   : > { %v1522_v2 = vld [vmem:[%s266_s8 + $0x20] sm:$0xff]  ;;  %v323_v3 = vadd.f32 %v1520_v1, %v1518_v0  ;;  %v346_v4 = vmax.f32 %v1518_v0, %v1520_v1  ;;  %v1528_v5 = vld [vmem:[%s266_s8 + $0x28] sm:$0xff]  ;;  %v1532_v7 = vld [vmem:[%s266_s8 + $0x10] sm:$0xff]  ;;  %1162 = vrcp.f32 %v1356_v16  ;;  %vm414_vm2 = vcmask 1041408   ;;  %s884_s12 = sld [smem:[#allocation2]]  ;;  %s1084_s30 = sshll.u32 %s1420_s5, 6 }
  0x33   : > { %v343_v6 = vmax.f32 %v1522_v2, %v1528_v5  ;;  %v1534_v8 = vld [vmem:[%s266_s8 + $0x18] sm:$0xff]  ;;  %v1536_v9 = vld [vmem:[%s266_s8] sm:$0xff]  ;;  %v1538_v10 = vld [vmem:[%s266_s8 + $0x8] sm:$0xff]  ;;  %v320_v11 = vadd.f32 %v1528_v5, %v1522_v2  ;;  %vm401_vm3 = vcmask 15360   ;;  %v1357_v45 = vmov 0   ;;  %s956_s28 = scalar_lea.hbm %s1654_s6, %s1084_s30  ;;  %s305_s5 = scalar_lea.vmem [#allocation9], %s1061_s15 }
  0x34   : > { %324 = vadd.xlane.f32.xlu0 %v323_v3  ;;  %347 = vmax.xlane.f32.xlu1 %v346_v4  ;;  %v317_v12 = vadd.f32 %v1534_v8, %v1532_v7  ;;  %v314_v13 = vadd.f32 %v1538_v10, %v1536_v9  ;;  %v340_v14 = vmax.f32 %v1532_v7, %v1534_v8  ;;  %v349_v33 = vld [vmem:[%s1649_s1] sm:$0x3]  ;;  %v351_v42 = vld [vmem:[%s1650_s2 + $0x8] sm:$0xff]  ;;  %v352_v43 = vld [vmem:[%s1650_s2 + $0x10] sm:$0xff]  ;;  %s957_s9 = sshll.u32 %s305_s5, 4  ;;  %s959_s16 = sshll.u32 %s956_s28, 4  ;;  %s958_s9 = int_to_ptr.vmem [resolvable:$true] %s957_s9  ;;  %s960_s16 = int_to_ptr.hbm [resolvable:$true] %s959_s16 }
  0x35   : > { %344 = vmax.xlane.f32.xlu2 %v343_v6  ;;  %v337_v15 = vmax.f32 %v1536_v9, %v1538_v10  ;;  %v350_v41 = vld [vmem:[%s1650_s2] sm:$0xff]  ;;  %v353_v44 = vld [vmem:[%s1650_s2 + $0x18] sm:$0xff]  ;;  %1160 = vset.pattern.permute.xlu0 %v1357_v45  ;;  %s945_s15 = scalar_lea.sflag [#allocation5], %s1504_s13  ;;  %s1294_s14 = sshra.s32 %s960_s16, 4  ;;  %s1295_s14 = int_to_ptr.hbm [resolvable:$true] %s1294_s14 }
  0x36   : > { %1159 = vset.pattern.permute.xlu2 %v1357_v45  ;;  %1161 = vset.pattern.permute.xlu1 %v1357_v45  ;;  %s1296_s17 = scalar_lea.hbm %s1295_s14, 64  ;;  %s1300_s7 = scalar_lea.hbm %s1654_s6, 128 }
  0x37   : > { %p1297_p1 = scmp.ne.s32.totalorder %s1295_s14, %s1296_s17  ;;  %p1301_p11 = scmp.lt.s32.totalorder %s1295_s14, %s1654_s6 }
  0x38   : > { %v1163_v17 = vpop.eup %1162  ;;  %p1302_p2 = scmp.lt.s32.totalorder %s1300_s7, %s1296_s17 }
  0x39   : > { %v327_v18 = vmul.f32 256.0, %v1163_v17  ;;  %vm331_vm0 = vweird.f32 %v1163_v17  ;;  %p1298_p4 = pnand %p1297_p1, %p1471_p3 }
  0x3a   : > { %p1303_p9 = por %p1302_p2, %p1301_p11 }
  0x3b   : > { %v328_v19 = vsub.f32 1.0, %v327_v18  ;;  %p1299_p8 = pneg %p1298_p4 }
  0x3c   : > { %321 = vadd.xlane.f32.xlu0 %v320_v11  ;;  %318 = vadd.xlane.f32.xlu1 %v317_v12 }
  0x3d   : > { %315 = vadd.xlane.f32.xlu2 %v314_v13  ;;  %v329_v20 = vmul.f32 %v1163_v17, %v328_v19  ;;  %p1304_p10 = pnand %p1303_p9, %p1299_p8 }
  0x3f   : > { %v330_v21 = vadd.f32 %v1163_v17, %v329_v20 }
  0x41   : > { %v332_v22 = vsel %vm331_vm0, %v1163_v17, %v330_v21 }
  0x44   : > { %341 = vmax.xlane.f32.xlu0 %v340_v14  ;;  %338 = vmax.xlane.f32.xlu1 %v337_v15 }
  0xa7   : > { %v325_v23 = vpop.xlane.xlu0 %324  ;;  %v348_v24 = vpop.xlane.xlu1 %347 }
  0xa8   : > { %v336_v25 = vmul.f32 %v332_v22, %v325_v23  ;;  %391 = vmatpush.msra.mxu1 %v348_v24  ;;  %v345_v26 = vpop.xlane.xlu2 %344 }
  0xaa   : > { %370 = vmatpush.msra.mxu0 %v336_v25  ;;  %392 = vmatpush.msra.mxu1 %v345_v26 }
  0xaf   : > { %v322_v27 = vpop.xlane.xlu0 %321  ;;  %v319_v28 = vpop.xlane.xlu1 %318 }
  0xb0   : > { %v335_v29 = vmul.f32 %v332_v22, %v322_v27  ;;  %v334_v30 = vmul.f32 %v332_v22, %v319_v28  ;;  %v316_v31 = vpop.xlane.xlu2 %315 }
  0xb1   : > { %v333_v32 = vmul.f32 %v332_v22, %v316_v31 }
  0xb2   : > { %371 = vmatpush.msra.mxu0 %v335_v29 }
  0xb4   : > { %372 = vmatpush.msra.mxu0 %v334_v30 }
  0xb6   : > { %373 = vmatpush.msra.mxu0 %v333_v32 }
  0xb7   : > { %v342_v34 = vpop.xlane.xlu0 %341  ;;  %v339_v35 = vpop.xlane.xlu1 %338  ;;  %1065 = vmatmul.msk.f32.vlgmr.msra.gmra.mxu0 %vm354_vm1, %v349_v33 }
  0xb8   : > { %393 = vmatpush.msra.mxu1 %v342_v34 }
  0xba   : > { %394 = vmatpush.msra.mxu1 %v339_v35 }
  0xbb   : > { %1066 = vmatmul.msk.f32.vlgmr.msra.gmra.mxu1 %vm354_vm1, %v349_v33 }
 0x134   : > { %v375_v36 = vpop.f32.mrf.mxu0 }
 0x135   : > { %v378_v37 = vmax.f32 %v375_v36, 0.0 }
 0x138   : > { %v396_v38 = vpop.f32.mrf.mxu1 }
 0x139   : > { %v399_v39 = vmax.f32 %v396_v38, 0.0 }
 0x13b   : > { %v400_v40 = vadd.f32 %v399_v39, %v378_v37 }
 0x13d   : > { %1067 = vmatpush.msk.msra.mxu2 %vm414_vm2, %v400_v40 }
 0x13e   : > { %1068 = vmatmul.msk.f32.vlgmr.msra.gmra.mxu2 %vm401_vm3, %v350_v41 }
 0x146   : > { %1069 = vmatmul.msk.f32.gmra.mxu2 %vm401_vm3, %v351_v42 }
 0x14e   : > { %1070 = vmatmul.msk.f32.gmra.mxu2 %vm401_vm3, %v352_v43 }
 0x156   : > { %1071 = vmatmul.msk.f32.gmra.mxu2 %vm401_vm3, %v353_v44 }
 0x1c1   : > { %v435_v46 = vpop.f32.mrf.mxu2 }
 0x1c2   : > { %v1072_v47 = vmul.f32 -1.442695, %v435_v46  ;;  %v690_v46 = vld [vmem:[#allocation8 + $0xf0] sm:$0xff] }
 0x1c3   : > { %724 = vmatpush.msra.mxu3 %v690_v46  ;;  %v662_v46 = vld [vmem:[#allocation8 + $0x10] sm:$0xff] }
 0x1c4   : > { %1164 = vpow2.f32 %v1072_v47  ;;  %v722_v47 = vld [vmem:[#allocation8 + $0x1f0] sm:$0xff] }
 0x1c5   : > { %744 = vmatpush.msrb.mxu2 %v722_v47  ;;  %v694_v47 = vld [vmem:[#allocation8 + $0x110] sm:$0xff] }
 0x1c9   : > { %v438_v48 = vpop.f32.mrf.mxu2 }
 0x1ca   : > { %v1165_v49 = vpop.eup %1164  ;;  %v1073_v50 = vmul.f32 -1.442695, %v438_v48  ;;  %v691_v48 = vld [vmem:[#allocation8 + $0xf8] sm:$0xff] }
 0x1cb   : > { %v459_v51 = vadd.f32 1.0, %v1165_v49  ;;  %v723_v49 = vld [vmem:[#allocation8 + $0x1f8] sm:$0xff]  ;;  %764 = vmatpush.msrb.mxu0 %v691_v48 }
 0x1cc   : > { %1166 = vpow2.f32 %v1073_v50  ;;  %v688_v50 = vld [vmem:[#allocation8 + $0xe0] sm:$0xff]  ;;  %784 = vmatpush.msrb.mxu1 %v723_v49  ;;  %v663_v48 = vld [vmem:[#allocation8 + $0x18] sm:$0xff] }
 0x1cd   : > { %1168 = vrcp.f32 %v459_v51  ;;  %v474_v59 = vand.u32 2147483648, %v459_v51  ;;  %v472_v61 = vand.u32 2147483647, %v459_v51  ;;  %vm468_vm5 = vweird.f32 %v459_v51  ;;  %725 = vmatpush.msra.mxu3 %v688_v50  ;;  %v695_v49 = vld [vmem:[#allocation8 + $0x118] sm:$0xff]  ;;  %v660_v50 = vld [vmem:[#allocation8] sm:$0xff] }
 0x1cf   : > { %v475_v12 = vor.u32 1.1754944e-38, %v474_v59  ;;  %vm473_vm7 = vcmp.eq.f32.partialorder %v472_v61, 8.507059e+37  ;;  %v716_v59 = vld [vmem:[#allocation8 + $0x1c0] sm:$0xff]  ;;  %v717_v61 = vld [vmem:[#allocation8 + $0x1c8] sm:$0xff] }
 0x1d1   : > { %v441_v52 = vpop.f32.mrf.mxu2 }
 0x1d2   : > { %v1167_v53 = vpop.eup %1166  ;;  %v1074_v54 = vmul.f32 -1.442695, %v441_v52  ;;  %v689_v52 = vld [vmem:[#allocation8 + $0xe8] sm:$0xff] }
 0x1d3   : > { %v1169_v55 = vpop.eup %1168  ;;  %v460_v56 = vadd.f32 1.0, %v1167_v53  ;;  %v721_v53 = vld [vmem:[#allocation8 + $0x1e8] sm:$0xff]  ;;  %765 = vmatpush.msrb.mxu0 %v689_v52 }
 0x1d4   : > { %1170 = vpow2.f32 %v1074_v54  ;;  %v464_v57 = vmul.f32 %v1169_v55, %v459_v51  ;;  %vm469_vm4 = vweird.f32 %v1169_v55  ;;  %v720_v51 = vld [vmem:[#allocation8 + $0x1e0] sm:$0xff]  ;;  %v686_v54 = vld [vmem:[#allocation8 + $0xd0] sm:$0xff]  ;;  %785 = vmatpush.msrb.mxu1 %v721_v53  ;;  %v661_v52 = vld [vmem:[#allocation8 + $0x8] sm:$0xff] }
 0x1d5   : > { %1172 = vrcp.f32 %v460_v56  ;;  %vm470_vm6 = vmor %vm468_vm5, %vm469_vm4  ;;  %v489_v17 = vand.u32 2147483648, %v460_v56  ;;  %v487_v19 = vand.u32 2147483647, %v460_v56  ;;  %vm483_vm9 = vweird.f32 %v460_v56  ;;  %745 = vmatpush.msrb.mxu2 %v720_v51  ;;  %726 = vmatpush.msra.mxu3 %v686_v54  ;;  %v692_v51 = vld [vmem:[#allocation8 + $0x100] sm:$0xff]  ;;  %v693_v53 = vld [vmem:[#allocation8 + $0x108] sm:$0xff] }
 0x1d6   : > { %v465_v58 = vsub.f32 1.0, %v464_v57  ;;  %v719_v57 = vld [vmem:[#allocation8 + $0x1d8] sm:$0xff]  ;;  %v626_v54 = vld [vmem:[#allocation6 + $0xf0] sm:$0xff] }
 0x1d7   : > { %v490_v24 = vor.u32 1.1754944e-38, %v489_v17  ;;  %vm488_vm11 = vcmp.eq.f32.partialorder %v487_v19, 8.507059e+37  ;;  %786 = vmatpush.msrb.mxu1 %v719_v57  ;;  %v711_v17 = vld [vmem:[#allocation8 + $0x198] sm:$0xff]  ;;  %v708_v19 = vld [vmem:[#allocation8 + $0x180] sm:$0xff] }
 0x1d8   : > { %v466_v60 = vmul.f32 %v1169_v55, %v465_v58  ;;  %v684_v58 = vld [vmem:[#allocation8 + $0xc0] sm:$0xff]  ;;  %v659_v57 = vld [vmem:[#allocation6 + $0x1f8] sm:$0xff] }
 0x1d9   : > { %v444_v62 = vpop.f32.mrf.mxu2  ;;  %727 = vmatpush.msra.mxu3 %v684_v58  ;;  %787 = vmatpush.msrb.mxu1 %v717_v61  ;;  %v624_v58 = vld [vmem:[#allocation6 + $0xe0] sm:$0xff]  ;;  %v657_v61 = vld [vmem:[#allocation6 + $0x1e8] sm:$0xff] }
 0x1da   : > { %v1171_v63 = vpop.eup %1170  ;;  %v1075_v3 = vmul.f32 -1.442695, %v444_v62  ;;  %v467_v4 = vadd.f32 %v1169_v55, %v466_v60  ;;  %v685_v60 = vld [vmem:[#allocation8 + $0xc8] sm:$0xff]  ;;  %v682_v62 = vld [vmem:[#allocation8 + $0xb0] sm:$0xff] }
 0x1db   : > { %v1173_v6 = vpop.eup %1172  ;;  %v461_v11 = vadd.f32 1.0, %v1171_v63  ;;  %v714_v63 = vld [vmem:[#allocation8 + $0x1b0] sm:$0xff]  ;;  %728 = vmatpush.msra.mxu3 %v682_v62 }
 0x1dc   : > { %1174 = vpow2.f32 %v1075_v3  ;;  %v471_v13 = vsel %vm470_vm6, %v1169_v55, %v467_v4  ;;  %v479_v14 = vmul.f32 %v1173_v6, %v460_v56  ;;  %vm484_vm8 = vweird.f32 %v1173_v6  ;;  %v718_v55 = vld [vmem:[#allocation8 + $0x1d0] sm:$0xff]  ;;  %v687_v56 = vld [vmem:[#allocation8 + $0xd8] sm:$0xff] }
 0x1dd   : > { %1176 = vrcp.f32 %v461_v11  ;;  %v476_v15 = vsel %vm473_vm7, %v475_v12, %v471_v13  ;;  %vm485_vm10 = vmor %vm483_vm9, %vm484_vm8  ;;  %v504_v29 = vand.u32 2147483648, %v461_v11  ;;  %v502_v31 = vand.u32 2147483647, %v461_v11  ;;  %746 = vmatpush.msrb.mxu2 %v718_v55  ;;  %766 = vmatpush.msrb.mxu0 %v687_v56  ;;  %v683_v3 = vld [vmem:[#allocation8 + $0xb8] sm:$0xff]  ;;  %v681_v12 = vld [vmem:[#allocation8 + $0xa8] sm:$0xff] }
 0x1de   : > { %525 = vperm.xlu2 %1159, %v476_v15   ;;  %v480_v16 = vsub.f32 1.0, %v479_v14  ;;  %vm498_vm13 = vweird.f32 %v461_v11  ;;  %v715_v4 = vld [vmem:[#allocation8 + $0x1b8] sm:$0xff]  ;;  %v713_v13 = vld [vmem:[#allocation8 + $0x1a8] sm:$0xff]  ;;  %v678_v14 = vld [vmem:[#allocation8 + $0x90] sm:$0xff] }
 0x1df   : > { %v505_v34 = vor.u32 1.1754944e-38, %v504_v29  ;;  %vm503_vm15 = vcmp.eq.f32.partialorder %v502_v31, 8.507059e+37  ;;  %747 = vmatpush.msrb.mxu2 %v716_v59  ;;  %767 = vmatpush.msrb.mxu0 %v685_v60  ;;  %v710_v15 = vld [vmem:[#allocation8 + $0x190] sm:$0xff]  ;;  %v705_v29 = vld [vmem:[#allocation8 + $0x168] sm:$0xff]  ;;  %v627_v56 = vld [vmem:[#allocation6 + $0xf8] sm:$0xff] }
 0x1e0   : > { %v481_v18 = vmul.f32 %v1173_v6, %v480_v16  ;;  %788 = vmatpush.msrb.mxu1 %v715_v4  ;;  %v679_v16 = vld [vmem:[#allocation8 + $0x98] sm:$0xff]  ;;  %v702_v31 = vld [vmem:[#allocation8 + $0x150] sm:$0xff]  ;;  %v656_v59 = vld [vmem:[#allocation6 + $0x1e0] sm:$0xff] }
 0x1e1   : > { %748 = vmatpush.msrb.mxu2 %v714_v63  ;;  %768 = vmatpush.msrb.mxu0 %v683_v3  ;;  %v658_v55 = vld [vmem:[#allocation6 + $0x1f0] sm:$0xff]  ;;  %v625_v60 = vld [vmem:[#allocation6 + $0xe8] sm:$0xff]  ;;  %v623_v3 = vld [vmem:[#allocation6 + $0xd8] sm:$0xff] }
 0x1e2   : > { %v1175_v20 = vpop.eup %1174  ;;  %v482_v21 = vadd.f32 %v1173_v6, %v481_v18  ;;  %789 = vmatpush.msrb.mxu1 %v713_v13  ;;  %v676_v18 = vld [vmem:[#allocation8 + $0x80] sm:$0xff]  ;;  %v622_v62 = vld [vmem:[#allocation6 + $0xd0] sm:$0xff]  ;;  %v655_v4 = vld [vmem:[#allocation6 + $0x1d8] sm:$0xff] }
 0x1e3   : > { %v1177_v22 = vpop.eup %1176  ;;  %v462_v23 = vadd.f32 1.0, %v1175_v20  ;;  %769 = vmatpush.msrb.mxu0 %v681_v12  ;;  %v677_v20 = vld [vmem:[#allocation8 + $0x88] sm:$0xff]  ;;  %v654_v63 = vld [vmem:[#allocation6 + $0x1d0] sm:$0xff] }
 0x1e4   : > { %v486_v25 = vsel %vm485_vm10, %v1173_v6, %v482_v21  ;;  %v494_v26 = vmul.f32 %v1177_v22, %v461_v11  ;;  %vm499_vm12 = vweird.f32 %v1177_v22  ;;  %v680_v6 = vld [vmem:[#allocation8 + $0xa0] sm:$0xff]  ;;  %v709_v21 = vld [vmem:[#allocation8 + $0x188] sm:$0xff]  ;;  %790 = vmatpush.msrb.mxu1 %v711_v17  ;;  %v651_v17 = vld [vmem:[#allocation6 + $0x1b8] sm:$0xff] }
 0x1e5   : > { %1178 = vrcp.f32 %v462_v23  ;;  %v491_v27 = vsel %vm488_vm11, %v490_v24, %v486_v25  ;;  %vm500_vm14 = vmor %vm498_vm13, %vm499_vm12  ;;  %v519_v38 = vand.u32 2147483648, %v462_v23  ;;  %vm513_vm0 = vweird.f32 %v462_v23  ;;  %v712_v11 = vld [vmem:[#allocation8 + $0x1a0] sm:$0xff]  ;;  %729 = vmatpush.msra.mxu3 %v680_v6  ;;  %770 = vmatpush.msrb.mxu0 %v679_v16  ;;  %v675_v24 = vld [vmem:[#allocation8 + $0x78] sm:$0xff] }
 0x1e6   : > { %530 = vperm.xlu0 %1160, %v491_v27   ;;  %v495_v28 = vsub.f32 1.0, %v494_v26  ;;  %v517_v40 = vand.u32 2147483647, %v462_v23  ;;  %749 = vmatpush.msrb.mxu2 %v712_v11  ;;  %v707_v25 = vld [vmem:[#allocation8 + $0x178] sm:$0xff]  ;;  %v672_v26 = vld [vmem:[#allocation8 + $0x60] sm:$0xff]  ;;  %v621_v12 = vld [vmem:[#allocation6 + $0xc8] sm:$0xff] }
 0x1e7   : > { %v520_v42 = vor.u32 1.1754944e-38, %v519_v38  ;;  %730 = vmatpush.msra.mxu3 %v678_v14  ;;  %771 = vmatpush.msrb.mxu0 %v677_v20  ;;  %v704_v27 = vld [vmem:[#allocation8 + $0x160] sm:$0xff]  ;;  %v666_v38 = vld [vmem:[#allocation8 + $0x30] sm:$0xff]  ;;  %v653_v13 = vld [vmem:[#allocation6 + $0x1c8] sm:$0xff] }
 0x1e8   : > { %v496_v30 = vmul.f32 %v1177_v22, %v495_v28  ;;  %vm518_vm3 = vcmp.eq.f32.partialorder %v517_v40, 8.507059e+37  ;;  %750 = vmatpush.msrb.mxu2 %v710_v15  ;;  %791 = vmatpush.msrb.mxu1 %v709_v21  ;;  %v673_v28 = vld [vmem:[#allocation8 + $0x68] sm:$0xff]  ;;  %v667_v40 = vld [vmem:[#allocation8 + $0x38] sm:$0xff]  ;;  %v620_v6 = vld [vmem:[#allocation6 + $0xc0] sm:$0xff] }
 0x1e9   : > { %731 = vmatpush.msra.mxu3 %v676_v18  ;;  %772 = vmatpush.msrb.mxu0 %v675_v24  ;;  %v652_v11 = vld [vmem:[#allocation6 + $0x1c0] sm:$0xff]  ;;  %v618_v14 = vld [vmem:[#allocation6 + $0xb0] sm:$0xff]  ;;  %v619_v16 = vld [vmem:[#allocation6 + $0xb8] sm:$0xff] }
 0x1ea   : > { %v497_v32 = vadd.f32 %v1177_v22, %v496_v30  ;;  %751 = vmatpush.msrb.mxu2 %v708_v19  ;;  %792 = vmatpush.msrb.mxu1 %v707_v25  ;;  %v670_v30 = vld [vmem:[#allocation8 + $0x50] sm:$0xff]  ;;  %v616_v18 = vld [vmem:[#allocation6 + $0xa0] sm:$0xff]  ;;  %v617_v20 = vld [vmem:[#allocation6 + $0xa8] sm:$0xff] }
 0x1eb   : > { %v1179_v33 = vpop.eup %1178  ;;  %773 = vmatpush.msrb.mxu0 %v673_v28  ;;  %v650_v15 = vld [vmem:[#allocation6 + $0x1b0] sm:$0xff]  ;;  %v648_v19 = vld [vmem:[#allocation6 + $0x1a0] sm:$0xff]  ;;  %v649_v21 = vld [vmem:[#allocation6 + $0x1a8] sm:$0xff] }
 0x1ec   : > { %v501_v35 = vsel %vm500_vm14, %v1177_v22, %v497_v32  ;;  %v509_v36 = vmul.f32 %v1179_v33, %v462_v23  ;;  %vm514_vm1 = vweird.f32 %v1179_v33  ;;  %v674_v22 = vld [vmem:[#allocation8 + $0x70] sm:$0xff]  ;;  %v671_v32 = vld [vmem:[#allocation8 + $0x58] sm:$0xff]  ;;  %793 = vmatpush.msrb.mxu1 %v705_v29  ;;  %v613_v28 = vld [vmem:[#allocation6 + $0x88] sm:$0xff] }
 0x1ed   : > { %v506_v37 = vsel %vm503_vm15, %v505_v34, %v501_v35  ;;  %vm515_vm2 = vmor %vm513_vm0, %vm514_vm1  ;;  %v706_v23 = vld [vmem:[#allocation8 + $0x170] sm:$0xff]  ;;  %732 = vmatpush.msra.mxu3 %v674_v22  ;;  %v668_v34 = vld [vmem:[#allocation8 + $0x40] sm:$0xff]  ;;  %774 = vmatpush.msrb.mxu0 %v671_v32 }
 0x1ee   : > { %535 = vperm.xlu1 %1161, %v506_v37   ;;  %v510_v39 = vsub.f32 1.0, %v509_v36  ;;  %752 = vmatpush.msrb.mxu2 %v706_v23  ;;  %v700_v35 = vld [vmem:[#allocation8 + $0x140] sm:$0xff]  ;;  %v669_v36 = vld [vmem:[#allocation8 + $0x48] sm:$0xff]  ;;  %v614_v22 = vld [vmem:[#allocation6 + $0x90] sm:$0xff] }
 0x1ef   : > { %733 = vmatpush.msra.mxu3 %v672_v26  ;;  %v701_v37 = vld [vmem:[#allocation8 + $0x148] sm:$0xff]  ;;  %775 = vmatpush.msrb.mxu0 %v669_v36  ;;  %v646_v23 = vld [vmem:[#allocation6 + $0x190] sm:$0xff]  ;;  %v615_v24 = vld [vmem:[#allocation6 + $0x98] sm:$0xff] }
 0x1f0   : > { %v511_v41 = vmul.f32 %v1179_v33, %v510_v39  ;;  %753 = vmatpush.msrb.mxu2 %v704_v27  ;;  %v698_v39 = vld [vmem:[#allocation8 + $0x130] sm:$0xff]  ;;  %v647_v25 = vld [vmem:[#allocation6 + $0x198] sm:$0xff]  ;;  %v612_v26 = vld [vmem:[#allocation6 + $0x80] sm:$0xff] }
 0x1f1   : > { %734 = vmatpush.msra.mxu3 %v670_v30  ;;  %776 = vmatpush.msrb.mxu0 %v667_v40  ;;  %v644_v27 = vld [vmem:[#allocation6 + $0x180] sm:$0xff]  ;;  %v645_v29 = vld [vmem:[#allocation6 + $0x188] sm:$0xff]  ;;  %v610_v30 = vld [vmem:[#allocation6 + $0x70] sm:$0xff] }
 0x1f2   : > { %v512_v43 = vadd.f32 %v1179_v33, %v511_v41  ;;  %754 = vmatpush.msrb.mxu2 %v702_v31  ;;  %v699_v41 = vld [vmem:[#allocation8 + $0x138] sm:$0xff]  ;;  %v642_v31 = vld [vmem:[#allocation6 + $0x170] sm:$0xff]  ;;  %v609_v36 = vld [vmem:[#allocation6 + $0x68] sm:$0xff] }
 0x1f3   : > { %735 = vmatpush.msra.mxu3 %v668_v34  ;;  %v611_v32 = vld [vmem:[#allocation6 + $0x78] sm:$0xff]  ;;  %v608_v34 = vld [vmem:[#allocation6 + $0x60] sm:$0xff] }
 0x1f4   : > { %v516_v44 = vsel %vm515_vm2, %v1179_v33, %v512_v43  ;;  %v703_v33 = vld [vmem:[#allocation8 + $0x158] sm:$0xff]  ;;  %755 = vmatpush.msrb.mxu2 %v700_v35  ;;  %v696_v43 = vld [vmem:[#allocation8 + $0x120] sm:$0xff] }
 0x1f5   : > { %v521_v45 = vsel %vm518_vm3, %v520_v42, %v516_v44  ;;  %794 = vmatpush.msrb.mxu1 %v703_v33  ;;  %736 = vmatpush.msra.mxu3 %v666_v38  ;;  %v664_v42 = vld [vmem:[#allocation8 + $0x20] sm:$0xff]  ;;  %v665_v44 = vld [vmem:[#allocation8 + $0x28] sm:$0xff]  ;;  %v643_v33 = vld [vmem:[#allocation6 + $0x178] sm:$0xff] }
 0x1f6   : > { %540 = vperm.xlu2 %1159, %v521_v45   ;;  %756 = vmatpush.msrb.mxu2 %v698_v39  ;;  %v697_v45 = vld [vmem:[#allocation8 + $0x128] sm:$0xff]  ;;  %v640_v35 = vld [vmem:[#allocation6 + $0x160] sm:$0xff]  ;;  %v606_v38 = vld [vmem:[#allocation6 + $0x50] sm:$0xff] }
 0x1f7   : > { %795 = vmatpush.msrb.mxu1 %v701_v37  ;;  %737 = vmatpush.msra.mxu3 %v664_v42  ;;  %v641_v37 = vld [vmem:[#allocation6 + $0x168] sm:$0xff]  ;;  %v638_v39 = vld [vmem:[#allocation6 + $0x150] sm:$0xff]  ;;  %v607_v40 = vld [vmem:[#allocation6 + $0x58] sm:$0xff] }
 0x1f8   : > { %757 = vmatpush.msrb.mxu2 %v696_v43  ;;  %777 = vmatpush.msrb.mxu0 %v665_v44  ;;  %v604_v42 = vld [vmem:[#allocation6 + $0x40] sm:$0xff]  ;;  %v605_v44 = vld [vmem:[#allocation6 + $0x48] sm:$0xff] }
 0x1f9   : > { %796 = vmatpush.msrb.mxu1 %v699_v41  ;;  %738 = vmatpush.msra.mxu3 %v662_v46  ;;  %v639_v41 = vld [vmem:[#allocation6 + $0x158] sm:$0xff]  ;;  %v636_v43 = vld [vmem:[#allocation6 + $0x140] sm:$0xff]  ;;  %v602_v46 = vld [vmem:[#allocation6 + $0x30] sm:$0xff] }
 0x1fa   : > { %758 = vmatpush.msrb.mxu2 %v694_v47  ;;  %778 = vmatpush.msrb.mxu0 %v663_v48  ;;  %v634_v47 = vld [vmem:[#allocation6 + $0x130] sm:$0xff]  ;;  %v603_v48 = vld [vmem:[#allocation6 + $0x38] sm:$0xff] }
 0x1fb   : > { %797 = vmatpush.msrb.mxu1 %v697_v45  ;;  %739 = vmatpush.msra.mxu3 %v660_v50  ;;  %v637_v45 = vld [vmem:[#allocation6 + $0x148] sm:$0xff]  ;;  %v635_v50 = vld [vmem:[#allocation6 + $0x138] sm:$0xff] }
 0x1fc   : > { %759 = vmatpush.msrb.mxu2 %v692_v51  ;;  %779 = vmatpush.msrb.mxu0 %v661_v52  ;;  %v600_v51 = vld [vmem:[#allocation6 + $0x20] sm:$0xff] }
 0x1fd   : > { %798 = vmatpush.msrb.mxu1 %v695_v49  ;;  %804 = vmatpush.msrb.mxu3 %v626_v54  ;;  %v632_v52 = vld [vmem:[#allocation6 + $0x120] sm:$0xff]  ;;  %v633_v54 = vld [vmem:[#allocation6 + $0x128] sm:$0xff] }
 0x1fe   : > { %824 = vmatpush.msra.mxu2 %v658_v55  ;;  %844 = vmatpush.msra.mxu0 %v627_v56  ;;  %v598_v55 = vld [vmem:[#allocation6 + $0x10] sm:$0xff] }
 0x1ff   : > { %799 = vmatpush.msrb.mxu1 %v693_v53  ;;  %805 = vmatpush.msrb.mxu3 %v624_v58  ;;  %v601_v53 = vld [vmem:[#allocation6 + $0x28] sm:$0xff]  ;;  %v630_v56 = vld [vmem:[#allocation6 + $0x110] sm:$0xff]  ;;  %v631_v58 = vld [vmem:[#allocation6 + $0x118] sm:$0xff] }
 0x200   : > { %825 = vmatpush.msra.mxu2 %v656_v59  ;;  %845 = vmatpush.msra.mxu0 %v625_v60  ;;  %v596_v59 = vld [vmem:[#allocation6] sm:$0xff] }
 0x201   : > { %864 = vmatpush.msra.mxu1 %v659_v57  ;;  %806 = vmatpush.msrb.mxu3 %v622_v62  ;;  %v599_v57 = vld [vmem:[#allocation6 + $0x18] sm:$0xff]  ;;  %v597_v62 = vld [vmem:[#allocation6 + $0x8] sm:$0xff] }
 0x202   : > { %826 = vmatpush.msra.mxu2 %v654_v63  ;;  %846 = vmatpush.msra.mxu0 %v623_v3  ;;  %v629_v63 = vld [vmem:[#allocation6 + $0x108] sm:$0xff] }
 0x203   : > { %865 = vmatpush.msra.mxu1 %v657_v61  ;;  %807 = vmatpush.msrb.mxu3 %v620_v6  ;;  %v628_v61 = vld [vmem:[#allocation6 + $0x100] sm:$0xff] }
 0x204   : > { %827 = vmatpush.msra.mxu2 %v652_v11  ;;  %847 = vmatpush.msra.mxu0 %v621_v12  ;;  %v1358_v11 = vmov 32.0  }
 0x205   : > { %866 = vmatpush.msra.mxu1 %v655_v4  ;;  %808 = vmatpush.msrb.mxu3 %v618_v14  ;;  %1180 = vrcp.f32 %v1358_v11 }
 0x206   : > { %828 = vmatpush.msra.mxu2 %v650_v15  ;;  %848 = vmatpush.msra.mxu0 %v619_v16 }
 0x207   : > { %867 = vmatpush.msra.mxu1 %v653_v13  ;;  %809 = vmatpush.msrb.mxu3 %v616_v18 }
 0x208   : > { %829 = vmatpush.msra.mxu2 %v648_v19  ;;  %849 = vmatpush.msra.mxu0 %v617_v20 }
 0x209   : > { %868 = vmatpush.msra.mxu1 %v651_v17  ;;  %810 = vmatpush.msrb.mxu3 %v614_v22 }
 0x20a   : > { %830 = vmatpush.msra.mxu2 %v646_v23  ;;  %850 = vmatpush.msra.mxu0 %v615_v24 }
 0x20b   : > { %869 = vmatpush.msra.mxu1 %v649_v21  ;;  %811 = vmatpush.msrb.mxu3 %v612_v26 }
 0x20c   : > { %831 = vmatpush.msra.mxu2 %v644_v27  ;;  %851 = vmatpush.msra.mxu0 %v613_v28 }
 0x20d   : > { %870 = vmatpush.msra.mxu1 %v647_v25  ;;  %812 = vmatpush.msrb.mxu3 %v610_v30 }
 0x20e   : > { %832 = vmatpush.msra.mxu2 %v642_v31  ;;  %852 = vmatpush.msra.mxu0 %v611_v32 }
 0x20f   : > { %871 = vmatpush.msra.mxu1 %v645_v29  ;;  %813 = vmatpush.msrb.mxu3 %v608_v34 }
 0x210   : > { %833 = vmatpush.msra.mxu2 %v640_v35  ;;  %853 = vmatpush.msra.mxu0 %v609_v36 }
 0x211   : > { %872 = vmatpush.msra.mxu1 %v643_v33  ;;  %814 = vmatpush.msrb.mxu3 %v606_v38 }
 0x212   : > { %834 = vmatpush.msra.mxu2 %v638_v39  ;;  %854 = vmatpush.msra.mxu0 %v607_v40 }
 0x213   : > { %873 = vmatpush.msra.mxu1 %v641_v37  ;;  %815 = vmatpush.msrb.mxu3 %v604_v42 }
 0x214   : > { %835 = vmatpush.msra.mxu2 %v636_v43  ;;  %855 = vmatpush.msra.mxu0 %v605_v44 }
 0x215   : > { %874 = vmatpush.msra.mxu1 %v639_v41  ;;  %816 = vmatpush.msrb.mxu3 %v602_v46 }
 0x216   : > { %836 = vmatpush.msra.mxu2 %v634_v47  ;;  %856 = vmatpush.msra.mxu0 %v603_v48 }
 0x217   : > { %875 = vmatpush.msra.mxu1 %v637_v45  ;;  %817 = vmatpush.msrb.mxu3 %v600_v51 }
 0x218   : > { %837 = vmatpush.msra.mxu2 %v632_v52  ;;  %857 = vmatpush.msra.mxu0 %v601_v53 }
 0x219   : > { %876 = vmatpush.msra.mxu1 %v635_v50  ;;  %818 = vmatpush.msrb.mxu3 %v598_v55 }
 0x21a   : > { %838 = vmatpush.msra.mxu2 %v630_v56  ;;  %858 = vmatpush.msra.mxu0 %v599_v57 }
 0x21b   : > { %877 = vmatpush.msra.mxu1 %v633_v54  ;;  %819 = vmatpush.msrb.mxu3 %v596_v59 }
 0x21c   : > { %839 = vmatpush.msra.mxu2 %v628_v61  ;;  %859 = vmatpush.msra.mxu0 %v597_v62 }
 0x21d   : > { %878 = vmatpush.msra.mxu1 %v631_v58 }
 0x21f   : > { %879 = vmatpush.msra.mxu1 %v629_v63  ;;  %v885_v63 = vstv %s884_s12 }
 0x238   : > { %v526_v49 = vpop.permute.xlu2 %525 }
 0x239   : > { %v1572_v12 = vmul.f32 %v526_v49, %v1536_v9  ;;  %v1575_v13 = vmul.f32 %v526_v49, %v1538_v10  ;;  %v1181_v10 = vpop.eup %1180 }
 0x23a   : > { %v570_v24 = vmul.f32 32.0, %v1181_v10  ;;  %vm574_vm4 = vweird.f32 %v1181_v10 }
 0x23c   : > { %v571_v33 = vsub.f32 1.0, %v570_v24 }
 0x23e   : > { %v572_v42 = vmul.f32 %v1181_v10, %v571_v33 }
 0x240   : > { %v573_v49 = vadd.f32 %v1181_v10, %v572_v42 }
 0x242   : > { %v575_v52 = vsel %vm574_vm4, %v1181_v10, %v573_v49 }
 0x250   : > { %v541_v3 = vpop.permute.xlu2 %540 }
 0x251   : > { %v1578_v14 = vmul.f32 %v541_v3, %v1518_v0 }
 0x258   : > { %v531_v60 = vpop.permute.xlu0 %530 }
 0x259   : > { %v1566_v4 = vmul.f32 %v531_v60, %v1532_v7  ;;  %v1569_v6 = vmul.f32 %v531_v60, %v1534_v8  ;;  %v1581_v7 = vmul.f32 %v541_v3, %v1520_v1 }
 0x25b   : > { %v551_v8 = vadd.f32 %v1566_v4, %v1572_v12  ;;  %v560_v16 = vadd.f32 %v1569_v6, %v1575_v13  ;;  %v579_v0 = vmax.f32 %v1566_v4, %v1578_v14  ;;  %v588_v1 = vmax.f32 %v1569_v6, %v1581_v7 }
 0x260   : > { %v536_v15 = vpop.permute.xlu1 %535 }
 0x261   : > { %v1588_v17 = vmul.f32 %v536_v15, %v1522_v2  ;;  %v1591_v9 = vmul.f32 %v536_v15, %v1528_v5 }
 0x263   : > { %v552_v18 = vadd.f32 %v551_v8, %v1588_v17  ;;  %v561_v19 = vadd.f32 %v560_v16, %v1591_v9  ;;  %v578_v20 = vmax.f32 %v1572_v12, %v1588_v17  ;;  %v587_v2 = vmax.f32 %v1575_v13, %v1591_v9 }
 0x265   : > { %v553_v5 = vadd.f32 %v552_v18, %v1578_v14  ;;  %v562_v21 = vadd.f32 %v561_v19, %v1581_v7  ;;  %v580_v22 = vmax.f32 %v578_v20, %v579_v0  ;;  %v589_v23 = vmax.f32 %v587_v2, %v588_v1 }
 0x267   : > { %v554_v25 = vrot.slane %v553_v5, 4  ;;  %v563_v26 = vrot.slane %v562_v21, 4  ;;  %v590_v27 = vrot.slane %v589_v23, 4  ;;  %v581_v28 = vrot.slane %v580_v22, 4 }
 0x269   : > { %v555_v29 = vadd.f32 %v554_v25, %v553_v5  ;;  %v564_v30 = vadd.f32 %v563_v26, %v562_v21  ;;  %v582_v31 = vmax.f32 %v580_v22, %v581_v28  ;;  %v591_v32 = vmax.f32 %v589_v23, %v590_v27 }
 0x26b   : > { %v565_v34 = vrot.slane %v564_v30, 2  ;;  %v583_v35 = vrot.slane %v582_v31, 2  ;;  %v592_v36 = vrot.slane %v591_v32, 2  ;;  %v556_v37 = vrot.slane %v555_v29, 2 }
 0x26d   : > { %v584_v38 = vmax.f32 %v582_v31, %v583_v35  ;;  %v593_v39 = vmax.f32 %v591_v32, %v592_v36  ;;  %v557_v40 = vadd.f32 %v556_v37, %v555_v29  ;;  %v566_v41 = vadd.f32 %v565_v34, %v564_v30 }
 0x26f   : > { %v585_v43 = vrot.slane %v584_v38, 1  ;;  %v594_v44 = vrot.slane %v593_v39, 1  ;;  %v558_v47 = vrot.slane %v557_v40, 1  ;;  %v567_v48 = vrot.slane %v566_v41, 1 }
 0x271   : > { %v586_v45 = vmax.f32 %v584_v38, %v585_v43  ;;  %v595_v46 = vmax.f32 %v593_v39, %v594_v44  ;;  %v559_v50 = vadd.f32 %v558_v47, %v557_v40  ;;  %v568_v51 = vadd.f32 %v567_v48, %v566_v41 }
 0x273   : > { %740 = vmatmul.f32.vlgmr.msra.gmra.mxu3 %v586_v45  ;;  %760 = vmatmul.f32.vlgmr.msrb.gmra.mxu2 %v595_v46  ;;  %v576_v53 = vmul.f32 %v575_v52, %v559_v50  ;;  %v577_v54 = vmul.f32 %v575_v52, %v568_v51 }
 0x274   : > { %780 = vmatmul.f32.vlgmr.msrb.gmra.mxu0 %v586_v45  ;;  %800 = vmatmul.f32.vlgmr.msrb.gmra.mxu1 %v595_v46 }
 0x27b   : > { %820 = vmatmul.f32.vlgmr.msrb.gmra.mxu3 %v576_v53  ;;  %840 = vmatmul.f32.vlgmr.msra.gmra.mxu2 %v577_v54 }
 0x27c   : > { %860 = vmatmul.f32.vlgmr.msra.gmra.mxu0 %v576_v53  ;;  %880 = vmatmul.f32.vlgmr.msra.gmra.mxu1 %v577_v54 }
 0x2f1   : > { %v781_v55 = vpop.f32.mrf.mxu0  ;;  %v801_v56 = vpop.f32.mrf.mxu1 }
 0x2f2   : > { %v802_v59 = vadd.f32 %v801_v56, %v781_v55 }
 0x2f6   : > { %v741_v57 = vpop.f32.mrf.mxu3  ;;  %v761_v58 = vpop.f32.mrf.mxu2 }
 0x2f7   : > { %v762_v11 = vadd.f32 %v761_v58, %v741_v57 }
 0x2f9   : > { %v861_v60 = vpop.f32.mrf.mxu0  ;;  %v881_v62 = vpop.f32.mrf.mxu1 }
 0x2fa   : > { %v862_v61 = vadd.f32 %v861_v60, %v802_v59 }
 0x2fc   : > { %v882_v3 = vadd.f32 %v881_v62, %v862_v61 }
 0x2fe   : > { %v887_v15 = vadd.f32 %v885_v63, %v882_v3  ;;  %v821_v8 = vpop.f32.mrf.mxu3  ;;  %v841_v1 = vpop.f32.mrf.mxu2 }
 0x2ff   : > { %v822_v16 = vadd.f32 %v821_v8, %v762_v11 }
 0x300   : > { %v1077_v0 = vmul.f32 -1.442695, %v887_v15 }
 0x301   : > { %v842_v10 = vadd.f32 %v841_v1, %v822_v16 }
 0x302   : > { %1182 = vpow2.f32 %v1077_v0 }
 0x303   : > { %v886_v18 = vadd.f32 %v885_v63, %v842_v10 }
 0x305   : > { %v1076_v19 = vmul.f32 -1.442695, %v886_v18 }
 0x307   : > { %1184 = vpow2.f32 %v1076_v19 }
 0x308   : > { %v1183_v20 = vpop.eup %1182 }
 0x309   : > { %v895_v2 = vadd.f32 1.0, %v1183_v20 }
 0x30b   : > { %1186 = vrcp.f32 %v895_v2  ;;  %v922_v25 = vand.u32 2147483648, %v895_v2  ;;  %v920_v28 = vand.u32 2147483647, %v895_v2  ;;  %vm916_vm6 = vweird.f32 %v895_v2 }
 0x30d   : > { %v1185_v5 = vpop.eup %1184  ;;  %v923_v31 = vor.u32 1.1754944e-38, %v922_v25  ;;  %vm921_vm8 = vcmp.eq.f32.partialorder %v920_v28, 8.507059e+37 }
 0x30e   : > { %v894_v21 = vadd.f32 1.0, %v1185_v5 }
 0x310   : > { %1188 = vrcp.f32 %v894_v21  ;;  %v907_v34 = vand.u32 2147483648, %v894_v21  ;;  %v905_v37 = vand.u32 2147483647, %v894_v21  ;;  %vm901_vm10 = vweird.f32 %v894_v21 }
 0x311   : > { %v1187_v22 = vpop.eup %1186 }
 0x312   : > { %v912_v23 = vmul.f32 %v1187_v22, %v895_v2  ;;  %vm917_vm5 = vweird.f32 %v1187_v22  ;;  %v908_v43 = vor.u32 1.1754944e-38, %v907_v34  ;;  %vm906_vm12 = vcmp.eq.f32.partialorder %v905_v37, 8.507059e+37 }
 0x313   : > { %vm918_vm7 = vmor %vm916_vm6, %vm917_vm5 }
 0x314   : > { %v913_v24 = vsub.f32 1.0, %v912_v23 }
 0x316   : > { %v1189_v26 = vpop.eup %1188  ;;  %v914_v27 = vmul.f32 %v1187_v22, %v913_v24 }
 0x317   : > { %v897_v29 = vmul.f32 %v1189_v26, %v894_v21  ;;  %vm902_vm9 = vweird.f32 %v1189_v26 }
 0x318   : > { %v915_v30 = vadd.f32 %v1187_v22, %v914_v27  ;;  %vm903_vm11 = vmor %vm901_vm10, %vm902_vm9 }
 0x319   : > { %v898_v32 = vsub.f32 1.0, %v897_v29 }
 0x31a   : > { %v919_v33 = vsel %vm918_vm7, %v1187_v22, %v915_v30 }
 0x31b   : > { %v924_v35 = vsel %vm921_vm8, %v923_v31, %v919_v33  ;;  %v899_v36 = vmul.f32 %v1189_v26, %v898_v32 }
 0x31c   : > { %v927_v38 = vperm.slane %v924_v35, 0 }
 0x31d   : > { %v900_v39 = vadd.f32 %v1189_v26, %v899_v36 }
 0x31e   : > { %v929_v40 = vmul.f32 %v927_v38, %v1575_v13  ;;  %v931_v41 = vmul.f32 %v927_v38, %v1569_v6  ;;  %v933_v42 = vmul.f32 %v927_v38, %v1591_v9  ;;  %v935_v44 = vmul.f32 %v927_v38, %v1581_v7 }
 0x31f   : > { %v904_v45 = vsel %vm903_vm11, %v1189_v26, %v900_v39 }
 0x320   : > { %937 = vst [vmem:[%s305_s5 + $0x8] sm:$0xff] %v929_v40  ;;  %v909_v46 = vsel %vm906_vm12, %v908_v43, %v904_v45 }
 0x321   : > { %939 = vst [vmem:[%s305_s5 + $0x18] sm:$0xff] %v931_v41  ;;  %v926_v13 = vperm.slane %v909_v46, 0 }
 0x322   : > { %941 = vst [vmem:[%s305_s5 + $0x28] sm:$0xff] %v933_v42 }
 0x323   : > { %943 = vst [vmem:[%s305_s5 + $0x38] sm:$0xff] %v935_v44  ;;  %v928_v6 = vmul.f32 %v926_v13, %v1572_v12  ;;  %v930_v7 = vmul.f32 %v926_v13, %v1566_v4  ;;  %v932_v9 = vmul.f32 %v926_v13, %v1588_v17  ;;  %v934_v47 = vmul.f32 %v926_v13, %v1578_v14 }
 0x325   : > { %936 = vst [vmem:[%s305_s5] sm:$0xff] %v928_v6 }
 0x326   : > { %938 = vst [vmem:[%s305_s5 + $0x10] sm:$0xff] %v930_v7 }
 0x327   : > { %940 = vst [vmem:[%s305_s5 + $0x20] sm:$0xff] %v932_v9 }
 0x328   : > { %942 = vst [vmem:[%s305_s5 + $0x30] sm:$0xff] %v934_v47 }
 0x329   : > { %1307 = shalt.err (!%p1304_p10)
}
 0x32a   : > { %s1359_s13 = smov 256   ;;  %s1360_s12 = smov 16  }
 0x32b   : > { %1095 = dma.vmem_to_hbm [thread:$0]  (%p1471_p3), %s958_s9, 1024, %s960_s16, %s945_s15, %s1359_s13, %s1359_s13, %s1360_s12  }
 0x32c PF: > { %s974_s30 = sand.u32 1, %s1338_s23   ;;  %p1662_p12 = scmp.ge.s32.totalorder %s1350_s26, 2 }
 0x32d   : > { %s975_s21 = scalar_lea.sflag [#allocation5], %s974_s30 }
 0x32e   : > { %p1109_p13 = pnand %p1662_p12, %p1434_p6 }
 0x330   : > { %p1110_p0 = pneg %p1109_p13 }
 0x332   : > { %1333 = dma.done.wait (%p1110_p0), %s975_s21, 1024  }
 0x333   : > { %1335 = vsyncadd (%p1110_p0), %s975_s21, 4294966272  ;;  %p21_p5 = scmp.ge.s32.totalorder %s1461_s19, 4   ;;  %s1663_s23 = smov %s1342_s24 }
 0x334   : > { %s1664_s24 = smov %s1346_s25  ;;  %s1665_s25 = smov %s1477_s27 }
 0x335   : > { %s1666_s26 = smov %s1461_s19  ;;  %23 = sbr.rel (!%p21_p5) target bundleno = 8 (0x8), region = 97 }
 0x33a   :  { %981 = vsyncpa [#allocation4], 1 }
 0x33b   :  { %983 = vsyncpa [#allocation4 + $0x1], 1 }
 0x33c   :  { %984 = vsyncpa [#allocation7], 1 }
 0x33d   :  { %985 = vsyncpa [#allocation5], 1 }
 0x33e   :  { %987 = vsyncpa [#allocation5 + $0x1], 1 }

</bundles_post_ra>
